<compile_context>
chip_gen: v7x
topology: tpu7x:2x2x1
jax: 0.10.0
libtpu: 0.0.40
codegen_flags: <defaults>
</compile_context>

<pallas_src>
import jax
import jax.numpy as jnp
from jax.experimental import pallas as pl
from jax.experimental.pallas import tpu as pltpu

# Problem sizes (from the PyTorch module).
B, IN, OUT = 2, 10, 20
assert B == 2  # the in-kernel label select below is written for batch 2

# Constant-slab layout (packed once at init): rows 0..IN-1 = W^T, row IN = bias.
BIAS_ROW = IN
CONST_ROWS = 16
CONST_COLS = 128

MSE_SCALE = 1.0 / (B * OUT)   # trace-time reciprocal constants
CE_SCALE = 1.0 / B


def model_kernel(labels_ref, const_ref, x_ref, tgt_ref, out_ref):
    # Static views of the pre-packed constant slab.
    w_t = const_ref[0:IN, 0:OUT]                       # (IN, OUT), pre-transposed
    bias = const_ref[BIAS_ROW:BIAS_ROW + 1, 0:OUT]     # (1, OUT)

    x = x_ref[...]                                     # (B, IN)
    tgt = tgt_ref[...]                                 # (B, OUT)

    # Linear: v1 = x @ W^T + b  (single MXU op, no in-kernel transpose).
    v1 = jnp.dot(x, w_t, preferred_element_type=jnp.float32) + bias   # (B, OUT)

    # One-hot-free pick mask from SMEM labels (iota-compare, VPU only).
    col = jax.lax.broadcasted_iota(jnp.int32, (B, OUT), 1)
    row = jax.lax.broadcasted_iota(jnp.int32, (B, OUT), 0)
    lbl = jnp.where(row == 0, labels_ref[0], labels_ref[1])            # (B, OUT)
    pick_mask = col == lbl

    # Row-wise summands, stacked so ONE lane reduce covers mse / softmax / pick.
    diff = v1 - tgt
    m = jnp.max(v1, axis=-1, keepdims=True)                            # (B, 1)
    stacked = jnp.concatenate(
        [diff * diff,                        # rows 0..B-1   -> squared error
         jnp.exp(v1 - m),                    # rows B..2B-1  -> softmax denom
         jnp.where(pick_mask, v1, 0.0)],     # rows 2B..3B-1 -> picked logits
        axis=0)                                                         # (3B, OUT)
    red = jnp.sum(stacked, axis=-1, keepdims=True)                      # (3B, 1)

    sq = red[0:B]                      # (B, 1) sum of squared errors per row
    se = red[B:2 * B]                  # (B, 1) softmax denominator per row
    picked = red[2 * B:3 * B]          # (B, 1) v1[b, label_b]
    ce_rows = (m + jnp.log(se)) - picked                                # (B, 1)

    # mse + ce folded into one final reduce over a (2B, 1) vector.
    final_vec = jnp.concatenate([sq * MSE_SCALE, ce_rows * CE_SCALE], axis=0)
    out_ref[...] = jnp.sum(final_vec, keepdims=True)                    # (1, 1)


def pack_constants(w, b):
    """Build the (W^T, bias) constant slab ONCE at init (outside the jit)."""
    slab = jnp.zeros((CONST_ROWS, CONST_COLS), jnp.float32)
    slab = slab.at[0:IN, 0:OUT].set(w.T.astype(jnp.float32))
    slab = slab.at[BIAS_ROW, 0:OUT].set(b.astype(jnp.float32))
    return slab


@jax.jit
def model_forward(const_slab, x, target, labels):
    out = pl.pallas_call(
        model_kernel,
        out_shape=jax.ShapeDtypeStruct((1, 1), jnp.float32),
        grid=(),
        in_specs=[
            pl.BlockSpec(memory_space=pltpu.MemorySpace.SMEM),        # labels (B,) i32
            pl.BlockSpec((CONST_ROWS, CONST_COLS), lambda: (0, 0)),   # W^T + bias slab
            pl.BlockSpec((B, IN), lambda: (0, 0)),                    # x
            pl.BlockSpec((B, OUT), lambda: (0, 0)),                   # target
        ],
        out_specs=pl.BlockSpec((1, 1), lambda: (0, 0)),
    )(labels, const_slab, x, target)
    return out[0, 0]


if __name__ == "__main__":
    key = jax.random.PRNGKey(0)
    k_x, k_w, k_b, k_t = jax.random.split(key, 4)

    # Deterministic Linear(10, 20)-shaped parameters and inputs.
    bound = 1.0 / (IN ** 0.5)
    x = jax.random.normal(k_x, (B, IN), dtype=jnp.float32)
    w = jax.random.uniform(k_w, (OUT, IN), minval=-bound, maxval=bound,
                           dtype=jnp.float32)
    b = jax.random.uniform(k_b, (OUT,), minval=-bound, maxval=bound,
                           dtype=jnp.float32)

    # Deterministic stand-ins for torch.randn(2, 20) and labels [0, 1].
    target = jax.random.normal(k_t, (B, OUT), dtype=jnp.float32)
    labels = jnp.array([0, 1], dtype=jnp.int32)

    # One-time init-side packing of the static operands.
    const_slab = jax.block_until_ready(pack_constants(w, b))

    result = model_forward(const_slab, x, target, labels)
    jax.block_until_ready(result)

    # Pure-JAX reference check.
    v1 = x @ w.T + b
    mse_ref = jnp.mean((v1 - target) ** 2)
    logp = jax.nn.log_softmax(v1, axis=-1)
    ce_ref = -jnp.mean(logp[jnp.arange(B), labels])
    ref = mse_ref + ce_ref
    assert jnp.allclose(result, ref, rtol=1e-5, atol=1e-5), (result, ref)

    print("KERNEL_OK")
</pallas_src>

<mosaic_0001>
module attributes {stable_mosaic.version = 11 : i64} {
  func.func @model_kernel(%arg0: memref<2xi32, #tpu.memory_space<smem>>, %arg1: memref<16x128xf32, #tpu.memory_space<vmem>>, %arg2: memref<2x10xf32, #tpu.memory_space<vmem>>, %arg3: memref<2x20xf32, #tpu.memory_space<vmem>>, %arg4: memref<1x1xf32, #tpu.memory_space<vmem>>) attributes {dimension_semantics = [], scalar_prefetch = 0 : i64, scratch_operands = 0 : i64, tpu.core_type = #tpu.core_type<tc>} {
    %c0 = arith.constant 0 : index
    %c0_0 = arith.constant 0 : index
    %0 = vector.load %arg1[%c0, %c0_0] : memref<16x128xf32, #tpu.memory_space<vmem>>, vector<10x20xf32>
    %c10 = arith.constant 10 : index
    %c0_1 = arith.constant 0 : index
    %1 = vector.load %arg1[%c10, %c0_1] : memref<16x128xf32, #tpu.memory_space<vmem>>, vector<1x20xf32>
    %c0_2 = arith.constant 0 : index
    %c0_3 = arith.constant 0 : index
    %2 = vector.load %arg2[%c0_2, %c0_3] : memref<2x10xf32, #tpu.memory_space<vmem>>, vector<2x10xf32>
    %c0_4 = arith.constant 0 : index
    %c0_5 = arith.constant 0 : index
    %3 = vector.load %arg3[%c0_4, %c0_5] : memref<2x20xf32, #tpu.memory_space<vmem>>, vector<2x20xf32>
    %cst = arith.constant dense<0.000000e+00> : vector<2x20xf32>
    %4 = tpu.matmul %2, %0, %cst {dimension_numbers = #tpu.dot_dimension_numbers<[1], [0], [0], [1], [0, 0, 1, 1], [], []>} : vector<2x10xf32>, vector<10x20xf32>, vector<2x20xf32> -> vector<2x20xf32>
    %5 = vector.broadcast %1 : vector<1x20xf32> to vector<2x20xf32>
    %6 = arith.addf %4, %5 : vector<2x20xf32>
    %7 = tpu.iota {dimensions = array<i32: 1>} : vector<2x20xi32>
    %8 = tpu.iota {dimensions = array<i32: 0>} : vector<2x20xi32>
    %c0_i32 = arith.constant 0 : i32
    %9 = vector.broadcast %c0_i32 : i32 to vector<2x20xi32>
    %10 = arith.cmpi eq, %8, %9 : vector<2x20xi32>
    %c0_6 = arith.constant 0 : index
    %11 = memref.load %arg0[%c0_6] : memref<2xi32, #tpu.memory_space<smem>>
    %c1 = arith.constant 1 : index
    %12 = memref.load %arg0[%c1] : memref<2xi32, #tpu.memory_space<smem>>
    %13 = vector.broadcast %11 : i32 to vector<2x20xi32>
    %14 = vector.broadcast %12 : i32 to vector<2x20xi32>
    %15 = arith.select %10, %13, %14 : vector<2x20xi1>, vector<2x20xi32>
    %16 = arith.cmpi eq, %7, %15 : vector<2x20xi32>
    %17 = arith.subf %6, %3 : vector<2x20xf32>
    %cst_7 = arith.constant dense<0xFF800000> : vector<2xf32>
    %18 = vector.multi_reduction <maximumf>, %6, %cst_7 [1] : vector<2x20xf32> to vector<2xf32>
    %19 = vector.shape_cast %18 : vector<2xf32> to vector<2x1xf32>
    %20 = arith.mulf %17, %17 : vector<2x20xf32>
    %21 = vector.broadcast %19 : vector<2x1xf32> to vector<2x20xf32>
    %22 = arith.subf %6, %21 : vector<2x20xf32>
    %23 = math.exp %22 : vector<2x20xf32>
    %cst_8 = arith.constant 0.000000e+00 : f32
    %24 = vector.broadcast %cst_8 : f32 to vector<2x20xf32>
    %25 = arith.select %16, %6, %24 : vector<2x20xi1>, vector<2x20xf32>
    %26 = tpu.concatenate %20, %23, %25 in 0 : vector<2x20xf32>, vector<2x20xf32>, vector<2x20xf32> -> vector<6x20xf32>
    %cst_9 = arith.constant dense<0.000000e+00> : vector<6xf32>
    %27 = vector.multi_reduction <add>, %26, %cst_9 [1] : vector<6x20xf32> to vector<6xf32>
    %28 = vector.shape_cast %27 : vector<6xf32> to vector<6x1xf32>
    %29 = vector.extract_strided_slice %28 {offsets = [0, 0], sizes = [2, 1], strides = [1, 1]} : vector<6x1xf32> to vector<2x1xf32>
    %30 = vector.extract_strided_slice %28 {offsets = [2, 0], sizes = [2, 1], strides = [1, 1]} : vector<6x1xf32> to vector<2x1xf32>
    %31 = vector.extract_strided_slice %28 {offsets = [4, 0], sizes = [2, 1], strides = [1, 1]} : vector<6x1xf32> to vector<2x1xf32>
    %32 = math.log %30 : vector<2x1xf32>
    %33 = arith.addf %19, %32 : vector<2x1xf32>
    %34 = arith.subf %33, %31 : vector<2x1xf32>
    %cst_10 = arith.constant 2.500000e-02 : f32
    %35 = vector.broadcast %cst_10 : f32 to vector<2x1xf32>
    %36 = arith.mulf %29, %35 : vector<2x1xf32>
    %cst_11 = arith.constant 5.000000e-01 : f32
    %37 = vector.broadcast %cst_11 : f32 to vector<2x1xf32>
    %38 = arith.mulf %34, %37 : vector<2x1xf32>
    %39 = tpu.concatenate %36, %38 in 0 : vector<2x1xf32>, vector<2x1xf32> -> vector<4x1xf32>
    %40 = vector.shape_cast %39 : vector<4x1xf32> to vector<1x4x1xf32>
    %cst_12 = arith.constant dense<0.000000e+00> : vector<1xf32>
    %41 = vector.multi_reduction <add>, %40, %cst_12 [1, 2] : vector<1x4x1xf32> to vector<1xf32>
    %42 = vector.shape_cast %41 : vector<1xf32> to vector<1x1x1xf32>
    %43 = vector.extract %42[0, 0, 0] : f32 from vector<1x1x1xf32>
    %44 = vector.broadcast %43 : f32 to vector<1x1xf32>
    %c0_13 = arith.constant 0 : index
    %c0_14 = arith.constant 0 : index
    %45 = vector.load %arg4[%c0_13, %c0_14] : memref<1x1xf32, #tpu.memory_space<vmem>>, vector<1x1xf32>
    tpu.vector_store %arg4[%c0_13, %c0_14], %44 {strides = array<i32>} : memref<1x1xf32, #tpu.memory_space<vmem>>, vector<1x1xf32>,
    return
  }
}

</mosaic_0001>

<bundles_post_ra>
// kernel: model_forward.1
= control target key start
LH: loop header
LB: loop body
LE: loop exit
PB: predicated region body
PF: predicated region fallthrough
CT: control target
= control target key end

     0   :  { %9 = vsyncpa [#allocation5], 0  ;;  %s377_s0 = inlined_call_operand.vmem [shape: s32[2], index: 0, kind: input, shape index: {}]   ;;  %s378_s1 = inlined_call_operand.hbm [shape: f32[16,128], index: 1, kind: input, shape index: {}]   ;;  %s379_s2 = inlined_call_operand.vmem [shape: f32[2,10], index: 2, kind: input, shape index: {}]   ;;  %s380_s3 = inlined_call_operand.vmem [shape: f32[2,20], index: 3, kind: input, shape index: {}]   ;;  %s381_s4 = inlined_call_operand.hbm [shape: f32[1,1], index: 4, kind: output, shape index: {}]  }
   0x1   :  { %10 = vsyncpa [#allocation3], 0 }
   0x2   :  { %11 = vsyncpa [#allocation4], 0  ;;  %s18_s17 = sshll.u32 %s377_s0, 4  ;;  %s19_s17 = int_to_ptr.vmem [resolvable:$true] %s18_s17 }
   0x3   :  { %s245_s18 = scalar_lea.vmem %s19_s17, 16  ;;  %p250_p1 = scmp.lt.s32.totalorder %s19_s17, %s19_s17 }
   0x4   :  { %p246_p0 = scmp.ne.s32.totalorder %s19_s17, %s245_s18  ;;  %p251_p2 = scmp.lt.s32.totalorder %s245_s18, %s245_s18 }
   0x6   :  { %p252_p3 = por %p251_p2, %p250_p1 }
   0x8   :  { %p253_p4 = pnand %p252_p3, %p246_p0 }
   0xa   :  { %256 = shalt.err (!%p253_p4)
}
   0xb   :  { %s307_s19 = smov [#allocation2]   ;;  %s308_s20 = smov [#allocation6]  }
   0xc   :  { %21 = dma.vmem_to_smem %s19_s17, 16, %s307_s19, [#allocation5]  }
   0xd   :  { %s27_s21 = sshll.u32 %s308_s20, 4  ;;  %s257_s24 = scalar_lea.hbm %s378_s1, 256  ;;  %s28_s21 = int_to_ptr.vmem [resolvable:$true] %s27_s21 }
   0xe   :  { %p258_p5 = scmp.ne.s32.totalorder %s378_s1, %s257_s24  ;;  %p261_p6 = scmp.lt.u32.totalorder %s257_s24, %s378_s1 }
  0x10   :  { %p263_p7 = pnand %p261_p6, %p258_p5 }
  0x12   :  { %266 = shalt.err (!%p263_p7)
}
  0x13   :  { %s267_s28 = scalar_lea.vmem %s28_s21, 256  ;;  %p272_p9 = scmp.lt.s32.totalorder %s28_s21, %s28_s21 }
  0x14   :  { %p268_p8 = scmp.ne.s32.totalorder %s28_s21, %s267_s28  ;;  %p273_p10 = scmp.lt.s32.totalorder %s267_s28, %s267_s28 }
  0x16   :  { %p274_p11 = por %p273_p10, %p272_p9 }
  0x18   :  { %p275_p12 = pnand %p274_p11, %p268_p8 }
  0x1a   :  { %278 = shalt.err (!%p275_p12)
}
  0x1b   :  { %s309_s29 = smov 128   ;;  %s310_s30 = smov 8  }
  0x1c   :  { %33 = dma.hbm_to_vmem [thread:$0]  %s378_s1, 256, %s28_s21, [#allocation3], %s309_s29, %s309_s29, %s310_s30  }
  0x1d   :  { %301 = dma.done.wait [#allocation5], 16  }
  0x1e   :  { %302 = vsyncadd [#allocation5], 4294967280 }
  0x1f   :  { %303 = dma.done.wait [#allocation3], 256  }
  0x20   :  { %304 = vsyncadd [#allocation3], 4294967040 }
  0x21   :  { %44 = sfence }
  0x22   :  { %v45_v0 = vld [vmem:[#allocation6] sm:$0xff]  ;;  %v46_v1 = vld [vmem:[#allocation6 + $0x8] sm:$0x3]  ;;  %vm58_vm0 = vcmask 1041408   ;;  %v311_v2 = vmov 0.0|0.0   ;;  %vm312_vm1 = vmmov 1   ;;  %v132_v11 = vlaneseq }
  0x23   :  { %226 = vmatprep.subr.bf16.mxu0 %v311_v2  ;;  %v227_v3 = vpack.c.bf16 %v46_v1, %v45_v0  ;;  %vm228_vm2 = vmpackc.low %vm58_vm0, %vm312_vm1  ;;  %vm313_vm3 = vmmov 0   ;;  %v314_v4 = vmov 0.0   ;;  %v48_v5 = vld [vmem:[%s379_s2] sm:$0x3]  ;;  %vm54_vm4 = vcmask 80896   ;;  %s137_s8 = sld [smem:[#allocation2]] }
  0x24   :  { %223 = vmatprep.mubr.msk.f32.mxu0 %vm313_vm3, %v314_v4  ;;  %v212_v6 = vld [vmem:[#allocation6 + $0xa] ss:$0 sm:$0xff]  ;;  %vm144_vm5 = vcmask 156672   ;;  %s215_s9 = sld [smem:[#allocation2 + $0x1]]  ;;  %v135_v14 = vshrl.u32 %v132_v11, 7  ;;  %v133_v18 = vand.u32 127, %v132_v11 }
  0x25   :  { %229 = vmatpush3.bf16.msk.msra.mxu0 %vm228_vm2, %v227_v3  ;;  %v49_v20 = vld [vmem:[%s380_s3] sm:$0x3]  ;;  %vm160_vm8 = vcmask 1043456   ;;  %vm162_vm9 = vcmask 160768   ;;  %vm182_vm10 = vcmask 3072   ;;  %s315_s3 = smov [#allocation7]  }
  0x26   :  { %vm136_vm6 = vcmp.eq.s32.totalorder %v135_v14, 0  ;;  %s202_s11 = sshll.u32 %s315_s3, 4  ;;  %vm194_vm11 = vcmask 0   ;;  %s203_s11 = int_to_ptr.vmem [resolvable:$true] %s202_s11 }
  0x27   :  { %s279_s13 = scalar_lea.vmem %s203_s11, 16  ;;  %s283_s14 = scalar_lea.vmem %s203_s11, 32 }
  0x28   :  { %224 = vmatmul.mubr.msk.f32.vlgmr.msra.gmra.mrb[0].mxu0 %vm54_vm4, %v48_v5  ;;  %p280_p13 = scmp.ne.s32.totalorder %s203_s11, %s279_s13  ;;  %p284_p0 = scmp.lt.s32.totalorder %s203_s11, %s203_s11 }
  0x29   :  { %v139_v16 = vstv %s137_s8  ;;  %p285_p1 = scmp.lt.s32.totalorder %s283_s14, %s279_s13 }
  0x2a   :  { %v140_v17 = vstv %s215_s9 }
  0x2b   :  { %v141_v19 = vsel %vm136_vm6, %v139_v16, %v140_v17  ;;  %p286_p2 = por %p285_p1, %p284_p0 }
  0x2c   :  { %vm142_vm7 = vcmp.eq.s32.totalorder %v133_v18, %v141_v19 }
  0x2d   :  { %p287_p3 = pnand %p286_p2, %p280_p13 }
  0xfb   :  { %v128_v7 = vpop.f32.mrb[0].mxu0 }
  0xfc   :  { %v129_v8 = vadd.f32 %v212_v6, %v128_v7  ;;  %v225_v9 = vpop.f32.mrb[1].mxu0 }
  0xfe   :  { %v145_v10 = vsel %vm144_vm5, %v129_v8, -inf  ;;  %v143_v21 = vsub.f32 %v129_v8, %v49_v20  ;;  %v152_v22 = vsel %vm142_vm7, %v129_v8, 0.0 }
  0xff   :  { %146 = vmax.xlane.f32.xlu0 %v145_v10  ;;  %v157_v26 = vrot.slane %v152_v22, 4 }
 0x100   :  { %v148_v25 = vmul.f32 %v143_v21, %v143_v21 }
 0x18c   :  { %v147_v12 = vpop.xlane.xlu0 %146 }
 0x18d   :  { %v149_v13 = vsub.f32 %v129_v8, %v147_v12 }
 0x18f   :  { %v150_v15 = vmul.f32 1.442695, %v149_v13 }
 0x191   :  { %241 = vpow2.f32 %v150_v15 }
 0x19b   :  { %v242_v23 = vpop.eup %241 }
 0x19c   :  { %v154_v24 = vrot.slane %v242_v23, 6 }
 0x19e   :  { %v159_v27 = vsel %vm58_vm0, %v148_v25, %v154_v24 }
 0x19f   :  { %v161_v28 = vsel %vm160_vm8, %v159_v27, %v157_v26 }
 0x1a0   :  { %v163_v29 = vsel %vm162_vm9, %v161_v28, 0.0 }
 0x1a1   :  { %164 = vadd.xlane.f32.xlu0 %v163_v29 }
 0x22e   :  { %v165_v30 = vpop.xlane.xlu0 %164 }
 0x22f   :  { %243 = vlog2.f32 %v165_v30  ;;  %v173_v35 = vrot.slane %v165_v30, 4  ;;  %v176_v38 = vmul.f32 0.025, %v165_v30 }
 0x239   :  { %v244_v31 = vpop.eup %243 }
 0x23a   :  { %v167_v32 = vmul.f32 0.6931472, %v244_v31 }
 0x23c   :  { %v169_v33 = vrot.slane %v167_v32, 2 }
 0x23e   :  { %v171_v34 = vadd.f32 %v169_v33, %v147_v12 }
 0x240   :  { %v175_v36 = vsub.f32 %v171_v34, %v173_v35 }
 0x242   :  { %v177_v37 = vmul.f32 0.5, %v175_v36 }
 0x244   :  { %v179_v39 = vrot.slane %v177_v37, 6 }
 0x246   :  { %v181_v40 = vsel %vm58_vm0, %v176_v38, %v179_v39 }
 0x247   :  { %v183_v41 = vsel %vm182_vm10, %v181_v40, 0.0 }
 0x248   :  { %184 = vadd.xlane.f32.xlu1 %v183_v41 }
 0x2d5   :  { %v185_v42 = vpop.xlane.xlu1 %184 }
 0x2d6   :  { %v186_v43 = vrot.slane %v185_v42, 4 }
 0x2d8   :  { %v187_v44 = vadd.f32 %v186_v43, %v185_v42 }
 0x2da   :  { %v188_v45 = vrot.slane %v187_v44, 2 }
 0x2dc   :  { %v189_v46 = vadd.f32 %v188_v45, %v187_v44 }
 0x2de   :  { %v190_v47 = vrot.slane %v189_v46, 1 }
 0x2e0   :  { %v191_v48 = vadd.f32 %v190_v47, %v189_v46 }
 0x2e2   :  { %230 = vpush %v191_v48 }
 0x313   :  { %s231_s12 = spop %230 }
 0x314   :  { %v193_v49 = vstv %s231_s12 }
 0x315   :  { %195 = vst.msk [vmem:[#allocation7] sm:$0x1] %vm194_vm11, %v193_v49 }
 0x316   :  { %290 = shalt.err (!%p287_p3)
}
 0x317   :  { %s291_s17 = scalar_lea.hbm %s381_s4, 16 }
 0x318   :  { %p292_p4 = scmp.ne.s32.totalorder %s381_s4, %s291_s17  ;;  %p295_p5 = scmp.lt.u32.totalorder %s291_s17, %s381_s4 }
 0x31a   :  { %p297_p6 = pnand %p295_p5, %p292_p4 }
 0x31c   :  { %300 = shalt.err (!%p297_p6)
}
 0x31d   :  { %205 = dma.vmem_to_hbm [thread:$0]  %s203_s11, 16, %s381_s4, [#allocation4]  }
 0x31e   :  { %305 = dma.done.wait [#allocation4], 16  }
 0x31f   :  { %306 = vsyncadd [#allocation4], 4294967280 }
 0x320   :  { %209 = vsyncpa [#allocation3], 1 }
 0x321   :  { %210 = vsyncpa [#allocation4], 1 }
 0x322   :  { %211 = vsyncpa [#allocation5], 1 }

</bundles_post_ra>
